<compile_context>
chip_gen: v5e
topology: v5e:2x2
jax: 0.10.0
libtpu: 0.0.40
codegen_flags: <defaults>
</compile_context>

<pallas_src>
import functools

import jax
import jax.numpy as jnp
from jax.experimental import pallas as pl
from jax.experimental.pallas import tpu as pltpu

EPS = 1e-5
LANE = 128


def _round_up(x, m):
    return (x + m - 1) // m * m


def _pick_row_tile(rows, max_tile=512):
    """Largest multiple-of-8 divisor of `rows` <= max_tile (and < rows when
    possible so the grid actually has >1 step to pipeline)."""
    if rows % 8 != 0:
        return rows
    target = min(max_tile, max(8, rows // 2))
    t = (target // 8) * 8
    while rows % t != 0:
        t -= 8
    return t


def _cparams():
    return pltpu.CompilerParams(dimension_semantics=("parallel",))


# ------------------------------ kernels --------------------------------------

def _partial_stats(acc):
    """Stack per-channel sum / sum-of-squares into a (1, 2, C) tile."""
    s = jnp.sum(acc, axis=0, keepdims=True)
    sq = jnp.sum(acc * acc, axis=0, keepdims=True)
    return jnp.concatenate([s, sq], axis=0)[None]


def _k_conv1x1_stats(x_ref, w_ref, h_ref, st_ref):
    """h = x @ w (bf16 MXU inputs, f32 accumulate); emit BN partial sums."""
    acc = jnp.dot(x_ref[...].astype(jnp.bfloat16), w_ref[...],
                  preferred_element_type=jnp.float32)
    h_ref[...] = acc.astype(h_ref.dtype)
    st_ref[...] = _partial_stats(acc)


def _k_bn_relu_conv1x1_stats(h_ref, sc_ref, sh_ref, w_ref, o_ref, st_ref):
    """y = relu(h*scale+shift); o = y @ w; emit BN partial sums of o."""
    y = jnp.maximum(h_ref[...].astype(jnp.float32) * sc_ref[...] + sh_ref[...],
                    0.0)
    acc = jnp.dot(y.astype(jnp.bfloat16), w_ref[...],
                  preferred_element_type=jnp.float32)
    o_ref[...] = acc.astype(o_ref.dtype)
    st_ref[...] = _partial_stats(acc)


def _k_bn_relu_conv3x3_stats(h_ref, sc_ref, sh_ref, w_ref, o_ref, st_ref,
                             *, H, W, C):
    """y = relu(bn(h)); 3x3 'same' conv as ONE deep-K matmul over nine
    row-shifted, boundary-masked taps; emit BN partial sums."""
    h = h_ref[...].astype(jnp.float32).reshape(H * W, C)
    y2 = jnp.maximum(h * sc_ref[...] + sh_ref[...], 0.0)   # (H*W, C) f32

    r = jax.lax.broadcasted_iota(jnp.int32, (H * W, 1), 0)
    row, col = r // W, r % W

    taps = []
    for dh in (-1, 0, 1):
        for dw in (-1, 0, 1):
            shift = dh * W + dw
            t = y2 if shift == 0 else jnp.roll(y2, -shift, axis=0)
            if dh == 0 and dw == 0:
                taps.append(t)
            else:
                ok = ((row + dh >= 0) & (row + dh < H) &
                      (col + dw >= 0) & (col + dw < W))
                taps.append(jnp.where(ok, t, 0.0))
    patch = jnp.concatenate(taps, axis=1).astype(jnp.bfloat16)   # (H*W, 9*C)

    acc = jnp.dot(patch, w_ref[...], preferred_element_type=jnp.float32)
    o_ref[...] = acc.astype(o_ref.dtype).reshape(o_ref.shape)
    st_ref[...] = _partial_stats(acc)


def _k_bn_residual_relu(h_ref, sc_ref, sh_ref, x_ref, o_ref):
    y = h_ref[...].astype(jnp.float32) * sc_ref[...] + sh_ref[...]
    o_ref[...] = jnp.maximum(y + x_ref[...], 0.0)


# ------------------------------ wrapper ---------------------------------------

def _bn_scale_shift(partial_stats, gamma, beta, count):
    """Fold per-tile (sum, sumsq) into training-mode BN scale/shift (f32)."""
    tot = jnp.sum(partial_stats, axis=0)            # (2, C)
    mean = tot[0] / count
    var = tot[1] / count - mean * mean              # biased var, like PyTorch
    scale = gamma[0] * jax.lax.rsqrt(var + EPS)
    shift = beta[0] - mean * scale
    return scale[None, :], shift[None, :]


def prepare_params(w1_oihw, w2_oihw, w3_oihw, g1, b1, g2, b2, g3, b3):
    """Pack weights in kernel layout: channels-last, lane-padded, bf16."""
    Cw, Cin = w1_oihw.shape[0], w1_oihw.shape[1]
    Cout = w3_oihw.shape[0]
    Cinp, Cwp, Coutp = (_round_up(c, LANE) for c in (Cin, Cw, Cout))

    w1 = jnp.zeros((Cinp, Cwp), jnp.float32).at[:Cin, :Cw].set(
        w1_oihw[:, :, 0, 0].T)
    w3 = jnp.zeros((Cwp, Coutp), jnp.float32).at[:Cw, :Cout].set(
        w3_oihw[:, :, 0, 0].T)
    # 3x3 taps stacked along K: tap t = kh*3+kw occupies rows [t*Cwp, t*Cwp+Cw)
    taps = jnp.transpose(w2_oihw, (2, 3, 1, 0)).reshape(9, Cw, Cw)
    w2 = (jnp.zeros((9, Cwp, Cwp), jnp.float32)
          .at[:, :Cw, :Cw].set(taps).reshape(9 * Cwp, Cwp))

    def vec(v, cp):
        return jnp.zeros((1, cp), jnp.float32).at[0, :v.shape[0]].set(v)

    return {
        "w1": w1.astype(jnp.bfloat16),
        "w2": w2.astype(jnp.bfloat16),
        "w3": w3.astype(jnp.bfloat16),
        "g1": vec(g1, Cwp), "b1": vec(b1, Cwp),
        "g2": vec(g2, Cwp), "b2": vec(b2, Cwp),
        "g3": vec(g3, Coutp), "b3": vec(b3, Coutp),
        "dims": (Cinp, Cwp, Coutp),
        "cout": Cout,
    }


def bottleneck_forward(x_nchw, params):
    """Pallas Bottleneck forward. x_nchw: (N, Cin, H, W) float32."""
    N, Cin, H, W = x_nchw.shape
    Cinp, Cwp, Coutp = params["dims"]
    Cout = params["cout"]
    assert Cin == Cout, "downsample=None requires inplanes == planes*expansion"
    assert Cinp == Coutp

    R = N * H * W
    TM = _pick_row_tile(R)
    G = R // TM
    bf16, f32 = jnp.bfloat16, jnp.float32

    # NCHW -> channels-last rows, channels zero-padded to a lane multiple.
    # TODO(synk): fold into the kernel DMA / require NHWC input instead.
    x2d = jnp.transpose(x_nchw, (0, 2, 3, 1)).reshape(R, Cin)
    x2d = jnp.pad(x2d, ((0, 0), (0, Cinp - Cin)))

    # ---- pass 1: conv1 (1x1) + BN1 partial stats ----------------------------
    h1, st1 = pl.pallas_call(
        _k_conv1x1_stats,
        out_shape=(jax.ShapeDtypeStruct((R, Cwp), bf16),
                   jax.ShapeDtypeStruct((G, 2, Cwp), f32)),
        grid=(G,),
        in_specs=[pl.BlockSpec((TM, Cinp), lambda i: (i, 0)),
                  pl.BlockSpec((Cinp, Cwp), lambda i: (0, 0))],
        out_specs=(pl.BlockSpec((TM, Cwp), lambda i: (i, 0)),
                   pl.BlockSpec((1, 2, Cwp), lambda i: (i, 0, 0))),
        compiler_params=_cparams(),
    )(x2d, params["w1"])
    sc1, sh1 = _bn_scale_shift(st1, params["g1"], params["b1"], R)

    # ---- pass 2: BN1 + relu, conv2 (3x3 fused taps) + BN2 partial stats -----
    h1n = h1.reshape(N, H, W, Cwp)
    h2, st2 = pl.pallas_call(
        functools.partial(_k_bn_relu_conv3x3_stats, H=H, W=W, C=Cwp),
        out_shape=(jax.ShapeDtypeStruct((N, H, W, Cwp), bf16),
                   jax.ShapeDtypeStruct((N, 2, Cwp), f32)),
        grid=(N,),
        in_specs=[pl.BlockSpec((1, H, W, Cwp), lambda n: (n, 0, 0, 0)),
                  pl.BlockSpec((1, Cwp), lambda n: (0, 0)),
                  pl.BlockSpec((1, Cwp), lambda n: (0, 0)),
                  pl.BlockSpec((9 * Cwp, Cwp), lambda n: (0, 0))],
        out_specs=(pl.BlockSpec((1, H, W, Cwp), lambda n: (n, 0, 0, 0)),
                   pl.BlockSpec((1, 2, Cwp), lambda n: (n, 0, 0))),
        compiler_params=_cparams(),
    )(h1n, sc1, sh1, params["w2"])
    sc2, sh2 = _bn_scale_shift(st2, params["g2"], params["b2"], R)

    # ---- pass 3: BN2 + relu, conv3 (1x1) + BN3 partial stats ----------------
    h3, st3 = pl.pallas_call(
        _k_bn_relu_conv1x1_stats,
        out_shape=(jax.ShapeDtypeStruct((R, Coutp), bf16),
                   jax.ShapeDtypeStruct((G, 2, Coutp), f32)),
        grid=(G,),
        in_specs=[pl.BlockSpec((TM, Cwp), lambda i: (i, 0)),
                  pl.BlockSpec((1, Cwp), lambda i: (0, 0)),
                  pl.BlockSpec((1, Cwp), lambda i: (0, 0)),
                  pl.BlockSpec((Cwp, Coutp), lambda i: (0, 0))],
        out_specs=(pl.BlockSpec((TM, Coutp), lambda i: (i, 0)),
                   pl.BlockSpec((1, 2, Coutp), lambda i: (i, 0, 0))),
        compiler_params=_cparams(),
    )(h2.reshape(R, Cwp), sc2, sh2, params["w3"])
    sc3, sh3 = _bn_scale_shift(st3, params["g3"], params["b3"], R)

    # ---- pass 4: BN3 + residual + relu --------------------------------------
    out2d = pl.pallas_call(
        _k_bn_residual_relu,
        out_shape=jax.ShapeDtypeStruct((R, Coutp), f32),
        grid=(G,),
        in_specs=[pl.BlockSpec((TM, Coutp), lambda i: (i, 0)),
                  pl.BlockSpec((1, Coutp), lambda i: (0, 0)),
                  pl.BlockSpec((1, Coutp), lambda i: (0, 0)),
                  pl.BlockSpec((TM, Cinp), lambda i: (i, 0))],
        out_specs=pl.BlockSpec((TM, Coutp), lambda i: (i, 0)),
        compiler_params=_cparams(),
    )(h3, sc3, sh3, x2d)

    out = out2d[:, :Cout].reshape(N, H, W, Cout)
    return jnp.transpose(out, (0, 3, 1, 2))


# --------------------------- pure-JAX reference -------------------------------

def bottleneck_ref(x, p):
    def bn(h, g, b):
        mu = jnp.mean(h, axis=(0, 2, 3), keepdims=True)
        var = jnp.mean((h - mu) ** 2, axis=(0, 2, 3), keepdims=True)
        return (h - mu) / jnp.sqrt(var + EPS) * g.reshape(1, -1, 1, 1) \
            + b.reshape(1, -1, 1, 1)

    def conv(h, w_oihw, pad):
        return jax.lax.conv_general_dilated(
            h, w_oihw, window_strides=(1, 1),
            padding=[(pad, pad), (pad, pad)],
            dimension_numbers=("NCHW", "OIHW", "NCHW"))

    out = jax.nn.relu(bn(conv(x, p["w1_oihw"], 0), p["g1v"], p["b1v"]))
    out = jax.nn.relu(bn(conv(out, p["w2_oihw"], 1), p["g2v"], p["b2v"]))
    out = bn(conv(out, p["w3_oihw"], 0), p["g3v"], p["b3v"])
    return jax.nn.relu(out + x)


if __name__ == "__main__":
    # Bottleneck(inplanes=16, planes=4): width = 4, out channels = 16.
    N, Cin, H, W = 2, 16, 16, 16
    planes = 4
    Cw = planes              # width = planes * (base_width/64) * groups
    Cout = planes * 4        # expansion = 4

    key = jax.random.PRNGKey(0)
    ks = jax.random.split(key, 10)
    w1_oihw = 0.2 * jax.random.normal(ks[0], (Cw, Cin, 1, 1), jnp.float32)
    w2_oihw = 0.2 * jax.random.normal(ks[1], (Cw, Cw, 3, 3), jnp.float32)
    w3_oihw = 0.2 * jax.random.normal(ks[2], (Cout, Cw, 1, 1), jnp.float32)
    g1 = 1.0 + 0.1 * jax.random.normal(ks[3], (Cw,), jnp.float32)
    b1 = 0.1 * jax.random.normal(ks[4], (Cw,), jnp.float32)
    g2 = 1.0 + 0.1 * jax.random.normal(ks[5], (Cw,), jnp.float32)
    b2 = 0.1 * jax.random.normal(ks[6], (Cw,), jnp.float32)
    g3 = 1.0 + 0.1 * jax.random.normal(ks[7], (Cout,), jnp.float32)
    b3 = 0.1 * jax.random.normal(ks[8], (Cout,), jnp.float32)
    x = jax.random.normal(ks[9], (N, Cin, H, W), jnp.float32)

    params = prepare_params(w1_oihw, w2_oihw, w3_oihw,
                            g1, b1, g2, b2, g3, b3)
    out = jax.block_until_ready(bottleneck_forward(x, params))

    ref_params = {
        "w1_oihw": w1_oihw, "w2_oihw": w2_oihw, "w3_oihw": w3_oihw,
        "g1v": g1, "b1v": b1, "g2v": g2, "b2v": b2, "g3v": g3, "b3v": b3,
    }
    ref = bottleneck_ref(x, ref_params)

    # bf16 matmul inputs + bf16 intermediate storage -> tolerance is looser
    # than the previous all-f32 version (f32 reference kept exact).
    if not jnp.allclose(out, ref, atol=5e-2, rtol=5e-2):
        raise AssertionError(
            f"mismatch: max abs diff = {float(jnp.max(jnp.abs(out - ref)))}")
    print("KERNEL_OK")
</pallas_src>

<mosaic_0001>
module attributes {stable_mosaic.version = 11 : i64} {
  func.func @_k_conv1x1_stats(%arg0: i32, %arg1: memref<256x128xf32, #tpu.memory_space<vmem>>, %arg2: memref<128x128xbf16, #tpu.memory_space<vmem>>, %arg3: memref<256x128xbf16, #tpu.memory_space<vmem>>, %arg4: memref<1x2x128xf32, #tpu.memory_space<vmem>>) attributes {dimension_semantics = [#tpu.dimension_semantics<parallel>], iteration_bounds = array<i64: 2>, scalar_prefetch = 0 : i64, scratch_operands = 0 : i64, tpu.core_type = #tpu.core_type<tc>, window_params = [{transform_indices = @transform_0, window_bounds = array<i64: 256, 128>}, {pipeline_mode = #tpu.pipeline_mode<synchronous>, transform_indices = @transform_1, window_bounds = array<i64: 128, 128>}, {transform_indices = @transform_2, window_bounds = array<i64: 256, 128>}, {transform_indices = @transform_3, window_bounds = array<i64: 1, 2, 128>}]} {
    %c0 = arith.constant 0 : index
    %c0_0 = arith.constant 0 : index
    %0 = vector.load %arg1[%c0, %c0_0] : memref<256x128xf32, #tpu.memory_space<vmem>>, vector<256x128xf32>
    %1 = arith.truncf %0 : vector<256x128xf32> to vector<256x128xbf16>
    %c0_1 = arith.constant 0 : index
    %c0_2 = arith.constant 0 : index
    %2 = vector.load %arg2[%c0_1, %c0_2] : memref<128x128xbf16, #tpu.memory_space<vmem>>, vector<128x128xbf16>
    %cst = arith.constant dense<0.000000e+00> : vector<256x128xf32>
    %3 = tpu.matmul %1, %2, %cst {dimension_numbers = #tpu.dot_dimension_numbers<[1], [0], [0], [1], [0, 0, 1, 1], [], []>} : vector<256x128xbf16>, vector<128x128xbf16>, vector<256x128xf32> -> vector<256x128xf32>
    %4 = arith.truncf %3 : vector<256x128xf32> to vector<256x128xbf16>
    %c0_3 = arith.constant 0 : index
    %c0_4 = arith.constant 0 : index
    %5 = vector.load %arg3[%c0_3, %c0_4] : memref<256x128xbf16, #tpu.memory_space<vmem>>, vector<256x128xbf16>
    tpu.vector_store %arg3[%c0_3, %c0_4], %4 {strides = array<i32>} : memref<256x128xbf16, #tpu.memory_space<vmem>>, vector<256x128xbf16>,
    %cst_5 = arith.constant dense<0.000000e+00> : vector<128xf32>
    %6 = vector.multi_reduction <add>, %3, %cst_5 [0] : vector<256x128xf32> to vector<128xf32>
    %7 = vector.shape_cast %6 : vector<128xf32> to vector<1x128xf32>
    %8 = arith.mulf %3, %3 : vector<256x128xf32>
    %cst_6 = arith.constant dense<0.000000e+00> : vector<128xf32>
    %9 = vector.multi_reduction <add>, %8, %cst_6 [0] : vector<256x128xf32> to vector<128xf32>
    %10 = vector.shape_cast %9 : vector<128xf32> to vector<1x128xf32>
    %11 = tpu.concatenate %7, %10 in 0 : vector<1x128xf32>, vector<1x128xf32> -> vector<2x128xf32>
    %12 = vector.shape_cast %11 : vector<2x128xf32> to vector<1x2x128xf32>
    %c0_7 = arith.constant 0 : index
    %c0_8 = arith.constant 0 : index
    %c0_9 = arith.constant 0 : index
    %13 = vector.load %arg4[%c0_7, %c0_8, %c0_9] : memref<1x2x128xf32, #tpu.memory_space<vmem>>, vector<1x2x128xf32>
    tpu.vector_store %arg4[%c0_7, %c0_8, %c0_9], %12 {strides = array<i32>} : memref<1x2x128xf32, #tpu.memory_space<vmem>>, vector<1x2x128xf32>,
    return
  }
  func.func @transform_0(%arg0: i32) -> (i32, i32) {
    %c0_i32 = arith.constant 0 : i32
    %c0_i32_0 = arith.constant 0 : i32
    return %arg0, %c0_i32 : i32, i32
  }
  func.func @transform_1(%arg0: i32) -> (i32, i32) {
    %c0_i32 = arith.constant 0 : i32
    %c0_i32_0 = arith.constant 0 : i32
    %c0_i32_1 = arith.constant 0 : i32
    return %c0_i32, %c0_i32_0 : i32, i32
  }
  func.func @transform_2(%arg0: i32) -> (i32, i32) {
    %c0_i32 = arith.constant 0 : i32
    %c0_i32_0 = arith.constant 0 : i32
    return %arg0, %c0_i32 : i32, i32
  }
  func.func @transform_3(%arg0: i32) -> (i32, i32, i32) {
    %c0_i32 = arith.constant 0 : i32
    %c0_i32_0 = arith.constant 0 : i32
    %c0_i32_1 = arith.constant 0 : i32
    return %arg0, %c0_i32, %c0_i32_0 : i32, i32, i32
  }
}

</mosaic_0001>

<bundles_post_ra>
// kernel: tpu_custom_call.1
= control target key start
LH: loop header
LB: loop body
LE: loop exit
PB: predicated region body
PF: predicated region fallthrough
CT: control target
= control target key end

     0   :  { %9 = vsyncpa [#allocation3], 0  ;;  %s1534_s0 = inlined_call_operand.hbm [shape: f32[512,128], index: 0, kind: input, shape index: {}]   ;;  %s1535_s1 = inlined_call_operand.hbm [shape: bf16[128,128], index: 1, kind: input, shape index: {}]   ;;  %s1536_s2 = inlined_call_operand.hbm [shape: bf16[512,128], index: 2, kind: output, shape index: {0}]   ;;  %s1537_s3 = inlined_call_operand.hbm [shape: f32[2,2,128], index: 3, kind: output, shape index: {1}]  }
   0x1   :  { %11 = vsyncpa [#allocation3 + $0x1], 0 }
   0x2   :  { %12 = vsyncpa [#allocation6], 0 }
   0x3   :  { %13 = vsyncpa [#allocation4], 0 }
   0x4   :  { %15 = vsyncpa [#allocation4 + $0x1], 0 }
   0x5   :  { %16 = vsyncpa [#allocation9], 0 }
   0x6   :  { %18 = vsyncpa [#allocation9 + $0x1], 0  ;;  %s1185_s12 = smov 0   ;;  %s1187_s13 = smov 0  }
   0x7   :  { %s1189_s14 = smov 0   ;;  %s1191_s15 = smov 0  }
   0x8 LB: > { %s1206_s16 = sadd.s32 4294967295, %s1156_s15   ;;  %s746_s17 = sadd.s32 4294967294, %s1156_s15   ;;  %s1156_s15 = sphi %s1191_s15, %s1547_s15   ;;  %s1152_s14 = sphi %s1189_s14, %s1546_s14   ;;  %s1148_s13 = sphi %s1187_s13, %s1545_s13   ;;  %s1144_s12 = sphi %s1185_s12, %s1544_s12  }
   0x9   : > { %p44_p0 = scmp.ne.s32.totalorder %s1148_s13, %s1144_s12  ;;  %p45_p1 = scmp.eq.s32.totalorder %s1206_s16, 0 }
   0xa   : > { %p89_p2 = scmp.eq.s32.totalorder %s1206_s16, 1  ;;  %p95_p3 = scmp.eq.s32.totalorder %s746_s17, 1 }
   0xb   : > { %p1215_p4 = por %p45_p1, %p44_p0  ;;  %p747_p5 = scmp.ge.s32.totalorder %s1156_s15, 1 }
   0xc   : > { %p1220_p6 = por %p95_p3, %p44_p0  ;;  %p128_p7 = scmp.lt.s32.totalorder %s1156_s15, 3 }
   0xd   : > { %s139_s22 = sshll.u32 %s1535_s1, 4  ;;  %s1158_s24 = smov [#allocation5]   ;;  %s140_s22 = int_to_ptr.hbm [resolvable:$true] %s139_s22 }
   0xe   : > { %p1228_p8 = pnand %p747_p5, %p128_p7  ;;  %s141_s25 = sshll.u32 %s1158_s24, 4  ;;  %s142_s25 = int_to_ptr.vmem [resolvable:$true] %s141_s25 }
   0xf   : > { %s1238_s26 = sadd.s32 1, %s1156_s15   ;;  %s1159_s27 = smov 64  }
  0x10   : > { %p936_p9 = pneg %p1228_p8  ;;  %s1160_s28 = smov 4  }
  0x11   : > { %s28_s29 = ssub.s32 %s1156_s15, %s1238_s26  ;;  %s31_s30 = sadd.s32 1, %s1152_s14 }
  0x12   : > { %p937_p10 = pnand %p936_p9, %p45_p1  ;;  %p29_p12 = scmp.eq.s32.totalorder %s28_s29, 0 }
  0x13   : > { %p38_p13 = scmp.ne.s32.totalorder %s1152_s14, %s1148_s13  ;;  %p39_p0 = scmp.eq.s32.totalorder %s1156_s15, 0 }
  0x14   : > { %939 = dma.hbm_to_vmem [thread:$0]  (!%p937_p10), %s140_s22, 1024, %s142_s25, [#allocation6], %s1159_s27, %s1159_s27, %s1160_s28  }
  0x15   : > { %p952_p3 = scmp.lt.s32.totalorder %s1156_s15, 2  ;;  %p40_p5 = por %p39_p0, %p38_p13 }
  0x16   : > { %s1248_s4 = scalar_select %p29_p12, %s1152_s14, %s31_s30  }
  0x17   : > { %p1252_p7 = por %p89_p2, %p38_p13  ;;  %s155_s6 = sand.u32 1, %s1152_s14  }
  0x18   : > { %s797_s7 = sshll.u32 %s1156_s15, 8  ;;  %s750_s8 = sshll.u32 %s155_s6, 8 }
  0x19   : > { %s164_s11 = scalar_lea.hbm %s1534_s0, %s797_s7  ;;  %s159_s20 = scalar_lea.vmem [#allocation2], %s750_s8 }
  0x1a   : > { %s165_s17 = sshll.u32 %s164_s11, 4  ;;  %s167_s21 = sshll.u32 %s159_s20, 4  ;;  %s166_s17 = int_to_ptr.hbm [resolvable:$true] %s165_s17  ;;  %s168_s21 = int_to_ptr.vmem [resolvable:$true] %s167_s21 }
  0x1b   : > { %p1263_p9 = pnand %p952_p3, %p40_p5  ;;  %s156_s24 = scalar_lea.sflag [#allocation3], %s155_s6 }
  0x1c   : > { %s1024_s25 = sshra.s32 %s166_s17, 4  ;;  %s1031_s30 = scalar_lea.hbm %s1534_s0, 512  ;;  %s1025_s25 = int_to_ptr.hbm [resolvable:$true] %s1024_s25 }
  0x1d   : > { %s1026_s27 = scalar_lea.hbm %s1025_s25, 256  ;;  %p1028_p10 = pneg %p1263_p9 }
  0x1e   : > { %p1027_p2 = scmp.ne.s32.totalorder %s1025_s25, %s1026_s27  ;;  %p1032_p0 = scmp.lt.s32.totalorder %s1025_s25, %s1534_s0 }
  0x1f   : > { %p1033_p3 = scmp.lt.s32.totalorder %s1031_s30, %s1026_s27 }
  0x20   : > { %p1029_p12 = pnand %p1028_p10, %p1027_p2 }
  0x21   : > { %p1034_p5 = por %p1033_p3, %p1032_p0 }
  0x22   : > { %p1030_p13 = pneg %p1029_p12 }
  0x24   : > { %p1035_p11 = pnand %p1034_p5, %p1030_p13 }
  0x26   : > { %1038 = shalt.err (!%p1035_p11)
}
  0x27   : > { %s1161_s6 = smov 128   ;;  %s1162_s9 = smov 8  }
  0x28   : > { %943 = dma.hbm_to_vmem [thread:$0]  (!%p1263_p9), %s166_s17, 4096, %s168_s21, %s156_s24, %s1161_s6, %s1161_s6, %s1162_s9  }
  0x29   : > { %179 = sbr.rel (%p1228_p8) target bundleno = 331 (0x14b), region = 28  ;;  %s1280_s10 = sand.u32 (!%p1228_p8), 1, %s1148_s13  }
  0x2a   : > { %s754_s11 = sshll.u32 (!%p1228_p8), %s1280_s10, 8  ;;  %s182_s20 = scalar_lea.sflag (!%p1228_p8), [#allocation3], %s1280_s10 }
  0x2b   : > { %s1284_s25 = scalar_lea.vmem (!%p1228_p8), [#allocation2], %s754_s11 }
  0x2e   : > { %1127 = dma.done.wait (%p1215_p4), %s182_s20, 4096  }
  0x2f   : > { %1129 = vsyncadd (%p1215_p4), %s182_s20, 4294963200 }
  0x30   : > { %1131 = dma.done.wait (%p45_p1), [#allocation6], 1024  }
  0x31   : > { %1133 = vsyncadd (%p45_p1), [#allocation6], 4294966272  ;;  %v805_v0 = vld [vmem:[#allocation5 + $0x38] sm:$0xff]  ;;  %v804_v1 = vld [vmem:[#allocation5 + $0x30] sm:$0xff]  ;;  %s756_s18 = sshll.u32 %s1280_s10, 7  ;;  %s806_s17 = sshll.u32 %s1206_s16, 7 }
  0x32   : > { %333 = vmatpush.bf16.msra.mxu0 %v805_v0  ;;  %902 = vmatpush.bf16.msra.mxu1 %v805_v0  ;;  %v803_v2 = vld [vmem:[#allocation5 + $0x28] sm:$0xff]  ;;  %v802_v3 = vld [vmem:[#allocation5 + $0x20] sm:$0xff]  ;;  %v801_v4 = vld [vmem:[#allocation5 + $0x18] sm:$0xff]  ;;  %s1337_s23 = scalar_lea.vmem [#allocation7], %s756_s18  ;;  %s612_s24 = scalar_lea.hbm %s1536_s2, %s806_s17 }
  0x33   : > { %903 = vmatpush.bf16.msra.mxu2 %v805_v0  ;;  %904 = vmatpush.bf16.msra.mxu3 %v805_v0  ;;  %v800_v5 = vld [vmem:[#allocation5 + $0x10] sm:$0xff]  ;;  %v799_v6 = vld [vmem:[#allocation5 + $0x8] sm:$0xff]  ;;  %v798_v7 = vld [vmem:[#allocation5] sm:$0xff]  ;;  %s613_s27 = sshll.u32 %s1337_s23, 4  ;;  %s615_s28 = sshll.u32 %s612_s24, 4  ;;  %s1424_s27 = int_to_ptr.vmem [resolvable:$true] %s613_s27  ;;  %s1426_s28 = int_to_ptr.hbm [resolvable:$true] %s615_s28 }
  0x34   : > { %v221_v8 = vld [vmem:[%s1284_s25] sm:$0xff]  ;;  %v222_v9 = vld [vmem:[%s1284_s25 + $0x8] sm:$0xff]  ;;  %v223_v20 = vld [vmem:[%s1284_s25 + $0x10] sm:$0xff]  ;;  %s596_s29 = scalar_lea.sflag [#allocation4], %s1280_s10  ;;  %s1068_s30 = sshra.s32 %s1426_s28, 4  ;;  %s1069_s30 = int_to_ptr.hbm [resolvable:$true] %s1068_s30 }
  0x35   : > { %v229_v10 = vld [vmem:[%s1284_s25 + $0x40] sm:$0xff]  ;;  %v230_v11 = vld [vmem:[%s1284_s25 + $0x48] sm:$0xff]  ;;  %v253_v14 = vpack.c.bf16 %v222_v9, %v221_v8  ;;  %v224_v21 = vld [vmem:[%s1284_s25 + $0x18] sm:$0xff]  ;;  %s1070_s7 = scalar_lea.hbm %s1069_s30, 128  ;;  %s1074_s9 = scalar_lea.hbm %s1536_s2, 256 }
  0x36   : > { %334 = vmatpush.bf16.msra.mxu0 %v804_v1  ;;  %905 = vmatpush.bf16.msra.mxu1 %v804_v1  ;;  %v237_v12 = vld [vmem:[%s1284_s25 + $0x80] sm:$0xff]  ;;  %v238_v13 = vld [vmem:[%s1284_s25 + $0x88] sm:$0xff]  ;;  %v257_v15 = vpack.c.bf16 %v230_v11, %v229_v10  ;;  %v231_v22 = vld [vmem:[%s1284_s25 + $0x50] sm:$0xff]  ;;  %v254_v26 = vpack.c.bf16 %v224_v21, %v223_v20  ;;  %p1071_p1 = scmp.ne.s32.totalorder %s1069_s30, %s1070_s7  ;;  %p1075_p11 = scmp.lt.s32.totalorder %s1069_s30, %s1536_s2 }
  0x37   : > { %906 = vmatpush.bf16.msra.mxu2 %v804_v1  ;;  %907 = vmatpush.bf16.msra.mxu3 %v804_v1  ;;  %v261_v16 = vpack.c.bf16 %v238_v13, %v237_v12  ;;  %v245_v17 = vld [vmem:[%s1284_s25 + $0xc0] sm:$0xff]  ;;  %v246_v18 = vld [vmem:[%s1284_s25 + $0xc8] sm:$0xff]  ;;  %v232_v23 = vld [vmem:[%s1284_s25 + $0x58] sm:$0xff]  ;;  %p1076_p9 = scmp.lt.s32.totalorder %s1074_s9, %s1070_s7 }
  0x38   : > { %v265_v19 = vpack.c.bf16 %v246_v18, %v245_v17  ;;  %v239_v24 = vld [vmem:[%s1284_s25 + $0x90] sm:$0xff]  ;;  %v240_v25 = vld [vmem:[%s1284_s25 + $0x98] sm:$0xff]  ;;  %v258_v27 = vpack.c.bf16 %v232_v23, %v231_v22  ;;  %v225_v32 = vld [vmem:[%s1284_s25 + $0x20] sm:$0xff]  ;;  %p1072_p4 = pnand %p1071_p1, %p1252_p7 }
  0x39   : > { %v262_v28 = vpack.c.bf16 %v240_v25, %v239_v24  ;;  %v247_v29 = vld [vmem:[%s1284_s25 + $0xd0] sm:$0xff]  ;;  %v248_v30 = vld [vmem:[%s1284_s25 + $0xd8] sm:$0xff]  ;;  %v226_v33 = vld [vmem:[%s1284_s25 + $0x28] sm:$0xff]  ;;  %p1077_p2 = por %p1076_p9, %p1075_p11 }
  0x3a   : > { %335 = vmatpush.bf16.msra.mxu0 %v803_v2  ;;  %908 = vmatpush.bf16.msra.mxu1 %v803_v2  ;;  %v266_v31 = vpack.c.bf16 %v248_v30, %v247_v29  ;;  %v233_v34 = vld [vmem:[%s1284_s25 + $0x60] sm:$0xff]  ;;  %v234_v35 = vld [vmem:[%s1284_s25 + $0x68] sm:$0xff]  ;;  %v255_v38 = vpack.c.bf16 %v226_v33, %v225_v32  ;;  %v227_v44 = vld [vmem:[%s1284_s25 + $0x30] sm:$0xff]  ;;  %p1073_p8 = pneg %p1072_p4 }
  0x3b   : > { %909 = vmatpush.bf16.msra.mxu2 %v803_v2  ;;  %910 = vmatpush.bf16.msra.mxu3 %v803_v2  ;;  %v241_v36 = vld [vmem:[%s1284_s25 + $0xa0] sm:$0xff]  ;;  %v242_v37 = vld [vmem:[%s1284_s25 + $0xa8] sm:$0xff]  ;;  %v259_v39 = vpack.c.bf16 %v234_v35, %v233_v34  ;;  %v228_v45 = vld [vmem:[%s1284_s25 + $0x38] sm:$0xff] }
  0x3c   : > { %v249_v40 = vld [vmem:[%s1284_s25 + $0xe0] sm:$0xff]  ;;  %v250_v41 = vld [vmem:[%s1284_s25 + $0xe8] sm:$0xff]  ;;  %v263_v42 = vpack.c.bf16 %v242_v37, %v241_v36  ;;  %v235_v46 = vld [vmem:[%s1284_s25 + $0x70] sm:$0xff]  ;;  %v256_v50 = vpack.c.bf16 %v228_v45, %v227_v44  ;;  %p1078_p10 = pnand %p1077_p2, %p1073_p8 }
  0x3d   : > { %v267_v43 = vpack.c.bf16 %v250_v41, %v249_v40  ;;  %v236_v47 = vld [vmem:[%s1284_s25 + $0x78] sm:$0xff]  ;;  %v243_v48 = vld [vmem:[%s1284_s25 + $0xb0] sm:$0xff] }
  0x3e   : > { %336 = vmatpush.bf16.msra.mxu0 %v802_v3  ;;  %911 = vmatpush.bf16.msra.mxu1 %v802_v3  ;;  %v244_v49 = vld [vmem:[%s1284_s25 + $0xb8] sm:$0xff]  ;;  %v260_v51 = vpack.c.bf16 %v236_v47, %v235_v46  ;;  %v251_v52 = vld [vmem:[%s1284_s25 + $0xf0] sm:$0xff] }
  0x3f   : > { %912 = vmatpush.bf16.msra.mxu2 %v802_v3  ;;  %913 = vmatpush.bf16.msra.mxu3 %v802_v3  ;;  %v252_v53 = vld [vmem:[%s1284_s25 + $0xf8] sm:$0xff]  ;;  %v264_v54 = vpack.c.bf16 %v244_v49, %v243_v48 }
  0x40   : > { %v268_v55 = vpack.c.bf16 %v252_v53, %v251_v52 }
  0x42   : > { %337 = vmatpush.bf16.msra.mxu0 %v801_v4  ;;  %914 = vmatpush.bf16.msra.mxu1 %v801_v4 }
  0x43   : > { %915 = vmatpush.bf16.msra.mxu2 %v801_v4  ;;  %916 = vmatpush.bf16.msra.mxu3 %v801_v4 }
  0x46   : > { %338 = vmatpush.bf16.msra.mxu0 %v800_v5  ;;  %917 = vmatpush.bf16.msra.mxu1 %v800_v5 }
  0x47   : > { %918 = vmatpush.bf16.msra.mxu2 %v800_v5  ;;  %919 = vmatpush.bf16.msra.mxu3 %v800_v5 }
  0x4a   : > { %339 = vmatpush.bf16.msra.mxu0 %v799_v6  ;;  %920 = vmatpush.bf16.msra.mxu1 %v799_v6 }
  0x4b   : > { %921 = vmatpush.bf16.msra.mxu2 %v799_v6  ;;  %922 = vmatpush.bf16.msra.mxu3 %v799_v6 }
  0x4e   : > { %340 = vmatpush.bf16.msra.mxu0 %v798_v7  ;;  %923 = vmatpush.bf16.msra.mxu1 %v798_v7 }
  0x4f   : > { %924 = vmatpush.bf16.msra.mxu2 %v798_v7  ;;  %925 = vmatpush.bf16.msra.mxu3 %v798_v7 }
  0x51   : > { %341 = vmatmul.bf16.vlgmr.msra.gmra.mxu0 %v253_v14  ;;  %361 = vmatmul.bf16.vlgmr.msra.gmra.mxu1 %v257_v15 }
  0x52   : > { %381 = vmatmul.bf16.vlgmr.msra.gmra.mxu2 %v261_v16  ;;  %401 = vmatmul.bf16.vlgmr.msra.gmra.mxu3 %v265_v19 }
  0x61   : > { %346 = vmatmul.bf16.gmra.mxu0 %v254_v26  ;;  %366 = vmatmul.bf16.gmra.mxu1 %v258_v27 }
  0x62   : > { %386 = vmatmul.bf16.gmra.mxu2 %v262_v28  ;;  %406 = vmatmul.bf16.gmra.mxu3 %v266_v31 }
  0x71   : > { %351 = vmatmul.bf16.gmra.mxu0 %v255_v38  ;;  %371 = vmatmul.bf16.gmra.mxu1 %v259_v39 }
  0x72   : > { %391 = vmatmul.bf16.gmra.mxu2 %v263_v42  ;;  %411 = vmatmul.bf16.gmra.mxu3 %v267_v43 }
  0x81   : > { %356 = vmatmul.bf16.gmra.mxu0 %v256_v50  ;;  %376 = vmatmul.bf16.gmra.mxu1 %v260_v51 }
  0x82   : > { %396 = vmatmul.bf16.gmra.mxu2 %v264_v54  ;;  %416 = vmatmul.bf16.gmra.mxu3 %v268_v55 }
  0xce   : > { %v342_v56 = vpop.f32.mrf.mxu0  ;;  %v1326_v57 = vpop.f32.mrf.mxu1 }
  0xcf   : > { %v523_v25 = vmul.f32 %v342_v56, %v342_v56 }
  0xd5   : > { %v1329_v58 = vpop.f32.mrf.mxu2  ;;  %v1335_v63 = vpop.f32.mrf.mxu3 }
  0xd6   : > { %v344_v59 = vpop.f32.mrf.mxu0  ;;  %v1331_v60 = vpop.f32.mrf.mxu1 }
  0xd7   : > { %v810_v61 = vpack.c.bf16 %v344_v59, %v342_v56  ;;  %v830_v62 = vpack.c.bf16 %v1331_v60, %v1326_v57  ;;  %v524_v24 = vmul.f32 %v344_v59, %v344_v59  ;;  %v486_v27 = vadd.f32 %v344_v59, %v342_v56 }
  0xd8   : > { %v531_v59 = vmul.f32 %v1326_v57, %v1326_v57 }
  0xd9   : > { %811 = vst [vmem:[%s1337_s23] sm:$0xff] %v810_v61   ;;  %v555_v28 = vadd.f32 %v524_v24, %v523_v25 }
  0xda   : > { %890 = vst [vmem:[%s1337_s23 + $0x20] sm:$0xff] %v830_v62  }
  0xdd   : > { %v1341_v0 = vpop.f32.mrf.mxu2  ;;  %v1347_v4 = vpop.f32.mrf.mxu3 }
  0xde   : > { %v347_v1 = vpop.f32.mrf.mxu0  ;;  %v1343_v2 = vpop.f32.mrf.mxu1  ;;  %v850_v3 = vpack.c.bf16 %v1341_v0, %v1329_v58  ;;  %v870_v5 = vpack.c.bf16 %v1347_v4, %v1335_v63 }
  0xdf   : > { %v525_v26 = vmul.f32 %v347_v1, %v347_v1  ;;  %v487_v30 = vadd.f32 %v486_v27, %v347_v1 }
  0xe0   : > { %894 = vst [vmem:[%s1337_s23 + $0x40] sm:$0xff] %v850_v3  }
  0xe1   : > { %898 = vst [vmem:[%s1337_s23 + $0x60] sm:$0xff] %v870_v5   ;;  %v556_v32 = vadd.f32 %v555_v28, %v525_v26 }
  0xe5   : > { %v1353_v6 = vpop.f32.mrf.mxu2  ;;  %v1359_v11 = vpop.f32.mrf.mxu3 }
  0xe6   : > { %v349_v7 = vpop.f32.mrf.mxu0  ;;  %v1355_v8 = vpop.f32.mrf.mxu1 }
  0xe7   : > { %v815_v9 = vpack.c.bf16 %v349_v7, %v347_v1  ;;  %v835_v10 = vpack.c.bf16 %v1355_v8, %v1343_v2  ;;  %v526_v29 = vmul.f32 %v349_v7, %v349_v7  ;;  %v488_v37 = vadd.f32 %v487_v30, %v349_v7 }
  0xe8   : > { %v532_v1 = vmul.f32 %v1331_v60, %v1331_v60  ;;  %v533_v7 = vmul.f32 %v1343_v2, %v1343_v2 }
  0xe9   : > { %887 = vst [vmem:[%s1337_s23 + $0x8] sm:$0xff] %v815_v9   ;;  %v557_v39 = vadd.f32 %v556_v32, %v526_v29 }
  0xea   : > { %891 = vst [vmem:[%s1337_s23 + $0x28] sm:$0xff] %v835_v10  }
  0xed   : > { %v1363_v12 = vpop.f32.mrf.mxu2  ;;  %v1369_v16 = vpop.f32.mrf.mxu3 }
  0xee   : > { %v352_v13 = vpop.f32.mrf.mxu0  ;;  %v1365_v14 = vpop.f32.mrf.mxu1  ;;  %v855_v15 = vpack.c.bf16 %v1363_v12, %v1353_v6  ;;  %v875_v17 = vpack.c.bf16 %v1369_v16, %v1359_v11 }
  0xef   : > { %v527_v33 = vmul.f32 %v352_v13, %v352_v13  ;;  %v489_v42 = vadd.f32 %v488_v37, %v352_v13 }
  0xf0   : > { %895 = vst [vmem:[%s1337_s23 + $0x48] sm:$0xff] %v855_v15   ;;  %v534_v15 = vmul.f32 %v1355_v8, %v1355_v8 }
  0xf1   : > { %899 = vst [vmem:[%s1337_s23 + $0x68] sm:$0xff] %v875_v17   ;;  %v558_v43 = vadd.f32 %v557_v39, %v527_v33 }
  0xf5   : > { %v1375_v18 = vpop.f32.mrf.mxu2  ;;  %v1381_v23 = vpop.f32.mrf.mxu3 }
  0xf6   : > { %v354_v19 = vpop.f32.mrf.mxu0  ;;  %v1377_v20 = vpop.f32.mrf.mxu1 }
  0xf7   : > { %v820_v21 = vpack.c.bf16 %v354_v19, %v352_v13  ;;  %v840_v22 = vpack.c.bf16 %v1377_v20, %v1365_v14  ;;  %v528_v40 = vmul.f32 %v354_v19, %v354_v19  ;;  %v490_v45 = vadd.f32 %v489_v42, %v354_v19 }
  0xf9   : > { %888 = vst [vmem:[%s1337_s23 + $0x10] sm:$0xff] %v820_v21   ;;  %v559_v46 = vadd.f32 %v558_v43, %v528_v40  ;;  %v535_v21 = vmul.f32 %v1365_v14, %v1365_v14 }
  0xfa   : > { %892 = vst [vmem:[%s1337_s23 + $0x30] sm:$0xff] %v840_v22  }
  0xfd   : > { %v1385_v31 = vpop.f32.mrf.mxu2  ;;  %v1391_v38 = vpop.f32.mrf.mxu3 }
  0xfe   : > { %v357_v34 = vpop.f32.mrf.mxu0  ;;  %v1387_v35 = vpop.f32.mrf.mxu1  ;;  %v860_v36 = vpack.c.bf16 %v1385_v31, %v1375_v18  ;;  %v880_v41 = vpack.c.bf16 %v1391_v38, %v1381_v23 }
  0xff   : > { %v529_v44 = vmul.f32 %v357_v34, %v357_v34  ;;  %v491_v47 = vadd.f32 %v490_v45, %v357_v34 }
 0x100   : > { %896 = vst [vmem:[%s1337_s23 + $0x50] sm:$0xff] %v860_v36  }
 0x101   : > { %900 = vst [vmem:[%s1337_s23 + $0x70] sm:$0xff] %v880_v41   ;;  %v560_v49 = vadd.f32 %v559_v46, %v529_v44 }
 0x105   : > { %v1397_v48 = vpop.f32.mrf.mxu2  ;;  %v1401_v56 = vpop.f32.mrf.mxu3 }
 0x106   : > { %v359_v50 = vpop.f32.mrf.mxu0  ;;  %v379_v51 = vpop.f32.mrf.mxu1 }
 0x107   : > { %v825_v52 = vpack.c.bf16 %v359_v50, %v357_v34  ;;  %v492_v53 = vadd.f32 %v491_v47, %v359_v50  ;;  %v530_v54 = vmul.f32 %v359_v50, %v359_v50  ;;  %v845_v55 = vpack.c.bf16 %v379_v51, %v1387_v35 }
 0x109   : > { %889 = vst [vmem:[%s1337_s23 + $0x18] sm:$0xff] %v825_v52   ;;  %v493_v61 = vadd.f32 %v492_v53, %v1326_v57  ;;  %v561_v62 = vadd.f32 %v560_v49, %v530_v54 }
 0x10a   : > { %893 = vst [vmem:[%s1337_s23 + $0x38] sm:$0xff] %v845_v55  }
 0x10b   : > { %v494_v3 = vadd.f32 %v493_v61, %v1331_v60  ;;  %v562_v5 = vadd.f32 %v561_v62, %v531_v59 }
 0x10d   : > { %v495_v57 = vadd.f32 %v494_v3, %v1343_v2  ;;  %v563_v9 = vadd.f32 %v562_v5, %v532_v1  ;;  %v399_v10 = vpop.f32.mrf.mxu2  ;;  %v1422_v19 = vpop.f32.mrf.mxu3 }
 0x10e   : > { %v865_v13 = vpack.c.bf16 %v399_v10, %v1397_v48  ;;  %v885_v2 = vpack.c.bf16 %v1422_v19, %v1401_v56 }
 0x10f   : > { %v564_v17 = vadd.f32 %v563_v9, %v533_v7  ;;  %v496_v60 = vadd.f32 %v495_v57, %v1355_v8  ;;  %v536_v8 = vmul.f32 %v1377_v20, %v1377_v20 }
 0x110   : > { %897 = vst [vmem:[%s1337_s23 + $0x58] sm:$0xff] %v865_v13  }
 0x111   : > { %v497_v22 = vadd.f32 %v496_v60, %v1365_v14  ;;  %v565_v24 = vadd.f32 %v564_v17, %v534_v15  ;;  %901 = vst [vmem:[%s1337_s23 + $0x78] sm:$0xff] %v885_v2  }
 0x113   : > { %v498_v25 = vadd.f32 %v497_v22, %v1377_v20  ;;  %v566_v26 = vadd.f32 %v565_v24, %v535_v21 }
 0x114   : > { %1081 = shalt.err (!%p1078_p10)
}
 0x115   : > { %s1163_s25 = smov 64   ;;  %s1164_s18 = smov 4   ;;  %v499_v14 = vadd.f32 %v498_v25, %v1387_v35  ;;  %v537_v20 = vmul.f32 %v1387_v35, %v1387_v35  ;;  %v567_v27 = vadd.f32 %v566_v26, %v536_v8  ;;  %v538_v30 = vmul.f32 %v379_v51, %v379_v51 }
 0x116   : > { %932 = dma.vmem_to_hbm [thread:$0]  (%p1252_p7), %s1424_s27, 2048, %s1426_s28, %s596_s29, %s1163_s25, %s1163_s25, %s1164_s18   ;;  %v539_v32 = vmul.f32 %v1329_v58, %v1329_v58  ;;  %v540_v36 = vmul.f32 %v1341_v0, %v1341_v0  ;;  %v541_v40 = vmul.f32 %v1353_v6, %v1353_v6  ;;  %v542_v42 = vmul.f32 %v1363_v12, %v1363_v12 }
 0x117   : > { %v568_v28 = vadd.f32 %v567_v27, %v537_v20  ;;  %v500_v29 = vadd.f32 %v499_v14, %v379_v51  ;;  %v544_v47 = vmul.f32 %v1385_v31, %v1385_v31  ;;  %v545_v51 = vmul.f32 %v1397_v48, %v1397_v48  ;;  %s757_s23 = sshll.u32 %s1280_s10, 1  ;;  %s794_s17 = sshll.u32 %s1206_s16, 1 }
 0x118   : > { %v546_v53 = vmul.f32 %v399_v10, %v399_v10  ;;  %v547_v54 = vmul.f32 %v1335_v63, %v1335_v63  ;;  %v548_v59 = vmul.f32 %v1347_v4, %v1347_v4  ;;  %v549_v62 = vmul.f32 %v1359_v11, %v1359_v11  ;;  %s628_s24 = scalar_lea.hbm %s1537_s3, %s794_s17  ;;  %s218_s27 = scalar_lea.vmem [#allocation8], %s757_s23 }
 0x119   : > { %v501_v33 = vadd.f32 %v500_v29, %v1329_v58  ;;  %v569_v34 = vadd.f32 %v568_v28, %v538_v30  ;;  %v543_v58 = vmul.f32 %v1375_v18, %v1375_v18  ;;  %v550_v3 = vmul.f32 %v1369_v16, %v1369_v16  ;;  %s630_s28 = sshll.u32 %s218_s27, 4  ;;  %s632_s29 = sshll.u32 %s628_s24, 4  ;;  %s631_s28 = int_to_ptr.vmem [resolvable:$true] %s630_s28  ;;  %s633_s29 = int_to_ptr.hbm [resolvable:$true] %s632_s29 }
 0x11a   : > { %vm592_vm0 = vcmask 1040384   ;;  %s601_s16 = scalar_lea.sflag [#allocation9], %s1280_s10  ;;  %s1096_s30 = sshra.s32 %s633_s29, 4  ;;  %s1097_s30 = int_to_ptr.hbm [resolvable:$true] %s1096_s30 }
 0x11b   : > { %v502_v37 = vadd.f32 %v501_v33, %v1341_v0  ;;  %v570_v39 = vadd.f32 %v569_v34, %v539_v32  ;;  %s1098_s7 = scalar_lea.hbm %s1097_s30, 2  ;;  %s1102_s9 = scalar_lea.hbm %s1537_s3, 4 }
 0x11c   : > { %p1099_p12 = scmp.ne.s32.totalorder %s1097_s30, %s1098_s7  ;;  %p1103_p3 = scmp.lt.s32.totalorder %s1097_s30, %s1537_s3 }
 0x11d   : > { %v503_v35 = vadd.f32 %v502_v37, %v1353_v6  ;;  %v571_v41 = vadd.f32 %v570_v39, %v540_v36  ;;  %p1104_p5 = scmp.lt.s32.totalorder %s1102_s9, %s1098_s7 }
 0x11e   : > { %p1100_p13 = pnand %p1099_p12, %p1252_p7 }
 0x11f   : > { %v572_v43 = vadd.f32 %v571_v41, %v541_v40  ;;  %v504_v44 = vadd.f32 %v503_v35, %v1363_v12  ;;  %p1105_p1 = por %p1104_p5, %p1103_p3 }
 0x120   : > { %p1101_p0 = pneg %p1100_p13 }
 0x121   : > { %v505_v45 = vadd.f32 %v504_v44, %v1375_v18  ;;  %v573_v46 = vadd.f32 %v572_v43, %v542_v42 }
 0x122   : > { %p1106_p4 = pnand %p1105_p1, %p1101_p0 }
 0x123   : > { %v506_v0 = vadd.f32 %v505_v45, %v1385_v31  ;;  %v574_v49 = vadd.f32 %v573_v46, %v543_v58 }
 0x125   : > { %v575_v6 = vadd.f32 %v574_v49, %v544_v47  ;;  %v507_v50 = vadd.f32 %v506_v0, %v1397_v48 }
 0x127   : > { %v576_v52 = vadd.f32 %v575_v6, %v545_v51  ;;  %v508_v12 = vadd.f32 %v507_v50, %v399_v10 }
 0x129   : > { %v509_v18 = vadd.f32 %v508_v12, %v1335_v63  ;;  %v577_v55 = vadd.f32 %v576_v52, %v546_v53  ;;  %v551_v63 = vmul.f32 %v1381_v23, %v1381_v23 }
 0x12b   : > { %v510_v31 = vadd.f32 %v509_v18, %v1347_v4  ;;  %v578_v61 = vadd.f32 %v577_v55, %v547_v54 }
 0x12d   : > { %v511_v48 = vadd.f32 %v510_v31, %v1359_v11  ;;  %v579_v1 = vadd.f32 %v578_v61, %v548_v59  ;;  %v552_v11 = vmul.f32 %v1391_v38, %v1391_v38 }
 0x12f   : > { %v580_v5 = vadd.f32 %v579_v1, %v549_v62  ;;  %v512_v7 = vadd.f32 %v511_v48, %v1369_v16  ;;  %v553_v16 = vmul.f32 %v1401_v56, %v1401_v56 }
 0x131   : > { %v513_v57 = vadd.f32 %v512_v7, %v1381_v23  ;;  %v581_v9 = vadd.f32 %v580_v5, %v550_v3  ;;  %v554_v23 = vmul.f32 %v1422_v19, %v1422_v19 }
 0x133   : > { %v514_v4 = vadd.f32 %v513_v57, %v1391_v38  ;;  %v582_v10 = vadd.f32 %v581_v9, %v551_v63 }
 0x135   : > { %v583_v13 = vadd.f32 %v582_v10, %v552_v11  ;;  %v515_v15 = vadd.f32 %v514_v4, %v1401_v56 }
 0x137   : > { %v584_v17 = vadd.f32 %v583_v13, %v553_v16  ;;  %v516_v60 = vadd.f32 %v515_v15, %v1422_v19 }
 0x139   : > { %v517_v2 = vrot.slane %v516_v60, 4  ;;  %v585_v21 = vadd.f32 %v584_v17, %v554_v23 }
 0x13b   : > { %v518_v22 = vadd.f32 %v517_v2, %v516_v60  ;;  %v586_v24 = vrot.slane %v585_v21, 4 }
 0x13d   : > { %v519_v8 = vrot.slane %v518_v22, 2  ;;  %v587_v25 = vadd.f32 %v586_v24, %v585_v21 }
 0x13f   : > { %v520_v38 = vadd.f32 %v519_v8, %v518_v22  ;;  %v588_v26 = vrot.slane %v587_v25, 2 }
 0x141   : > { %v521_v56 = vrot.slane %v520_v38, 1  ;;  %v589_v14 = vadd.f32 %v588_v26, %v587_v25 }
 0x143   : > { %v590_v20 = vrot.slane %v589_v14, 1  ;;  %v522_v19 = vadd.f32 %v521_v56, %v520_v38 }
 0x145   : > { %v591_v27 = vadd.f32 %v590_v20, %v589_v14 }
 0x147   : > { %v593_v28 = vsel %vm592_vm0, %v522_v19, %v591_v27 }
 0x148   : > { %594 = vst [vmem:[%s218_s27] sm:$0x3] %v593_v28 }
 0x149   : > { %1109 = shalt.err (!%p1106_p4)
}
 0x14a   : > { %933 = dma.vmem_to_hbm [thread:$0]  (%p1252_p7), %s631_s28, 32, %s633_s29, %s601_s16  }
 0x14b PF: > { %s644_s10 = sand.u32 1, %s1144_s12   ;;  %p1543_p8 = scmp.ge.s32.totalorder %s1156_s15, 2 }
 0x14c   : > { %s645_s25 = scalar_lea.sflag [#allocation4], %s644_s10 }
 0x14d   : > { %p945_p11 = pnand %p1543_p8, %p1220_p6 }
 0x14f   : > { %p946_p9 = pneg %p945_p11 }
 0x151   : > { %1135 = dma.done.wait (%p946_p9), %s645_s25, 2048  }
 0x152   : > { %1137 = vsyncadd (%p946_p9), %s645_s25, 4294965248  ;;  %s655_s18 = scalar_lea.sflag [#allocation9], %s644_s10 }
 0x153   : > { %1139 = dma.done.wait (%p946_p9), %s655_s18, 32  }
 0x154   : > { %1141 = vsyncadd (%p946_p9), %s655_s18, 4294967264  ;;  %p21_p7 = scmp.ge.s32.totalorder %s1238_s26, 4   ;;  %s1544_s12 = smov %s1148_s13 }
 0x155   : > { %s1545_s13 = smov %s1152_s14  ;;  %s1546_s14 = smov %s1248_s4 }
 0x156   : > { %s1547_s15 = smov %s1238_s26  ;;  %23 = sbr.rel (!%p21_p7) target bundleno = 8 (0x8), region = 94 }
 0x15b   :  { %661 = vsyncpa [#allocation3], 1 }
 0x15c   :  { %663 = vsyncpa [#allocation3 + $0x1], 1 }
 0x15d   :  { %664 = vsyncpa [#allocation6], 1 }
 0x15e   :  { %665 = vsyncpa [#allocation4], 1 }
 0x15f   :  { %667 = vsyncpa [#allocation4 + $0x1], 1 }
 0x160   :  { %668 = vsyncpa [#allocation9], 1 }
 0x161   :  { %670 = vsyncpa [#allocation9 + $0x1], 1 }

</bundles_post_ra>
